<compile_context>
chip_gen: v7x
topology: tpu7x:2x2x1
jax: 0.10.0
libtpu: 0.0.40
codegen_flags: <defaults>
</compile_context>

<pallas_src>
import functools
import math

import jax
import jax.numpy as jnp
from jax.experimental import pallas as pl
from jax.experimental.pallas import tpu as pltpu


_VMEM_LIMIT = 40 * 1024 * 1024          # fits v5e/v6e/v7x scoped budgets
_SQRT1_2 = 1.0 / math.sqrt(2.0)


# ---------------------------------------------------------------------------
# Tile picker: largest multiple of `mult` <= target that divides `dim`,
# else the full dimension (full-dim blocks always satisfy (8,128) rules).
# ---------------------------------------------------------------------------
def _pick_tile(dim, target, mult):
    if dim <= target:
        return dim
    cand = (target // mult) * mult
    while cand >= mult:
        if dim % cand == 0:
            return cand
        cand -= mult
    # TODO(synk): for awkward dims fall back to full-dim blocks; masked edge
    # tiles would be needed to avoid oversized VMEM blocks in that case.
    return dim


def _epilogue(y, activation):
    if activation == "gelu":
        # HF BERT "gelu" is the exact erf-based GELU (f32 epilogue math).
        return 0.5 * y * (1.0 + jax.lax.erf(y * _SQRT1_2))
    return y


def _layernorm_f32(h, gamma, beta, eps):
    mean = jnp.mean(h, axis=-1, keepdims=True)
    var = jnp.mean(jnp.square(h - mean), axis=-1, keepdims=True)
    return (h - mean) * jax.lax.rsqrt(var + eps) * gamma + beta


# ---------------------------------------------------------------------------
# Tiled linear  y = act(x @ W + b)   (bf16 in/out, f32 accumulation)
# Single-k specialization: no k axis, no scratch accumulator.
# ---------------------------------------------------------------------------
def _linear_nok_kernel(x_ref, w_ref, b_ref, o_ref, *, activation):
    y = jnp.dot(x_ref[...], w_ref[...],
                preferred_element_type=jnp.float32) + b_ref[...]
    o_ref[...] = _epilogue(y, activation).astype(o_ref.dtype)


def _linear_acc_kernel(x_ref, w_ref, b_ref, o_ref, acc_ref, *, activation):
    k = pl.program_id(2)

    @pl.when(k == 0)
    def _():
        acc_ref[...] = jnp.zeros_like(acc_ref)

    acc_ref[...] += jnp.dot(x_ref[...], w_ref[...],
                            preferred_element_type=jnp.float32)

    @pl.when(k == pl.num_programs(2) - 1)
    def _():
        y = acc_ref[...] + b_ref[...]
        o_ref[...] = _epilogue(y, activation).astype(o_ref.dtype)


def linear(x, w, b, activation="none", tm=512, tn=1024, tk_target=1024):
    M, K = x.shape
    N = w.shape[1]
    tm = _pick_tile(M, tm, 8)
    tn = _pick_tile(N, tn, 128)
    tk = K if K <= tk_target else _pick_tile(K, tk_target, 128)
    nk = K // tk
    b2 = b.reshape(1, N).astype(jnp.float32)

    if nk == 1:
        return pl.pallas_call(
            functools.partial(_linear_nok_kernel, activation=activation),
            out_shape=jax.ShapeDtypeStruct((M, N), jnp.bfloat16),
            grid=(M // tm, N // tn),
            in_specs=[
                pl.BlockSpec((tm, K), lambda i, j: (i, 0)),
                pl.BlockSpec((K, tn), lambda i, j: (0, j)),
                pl.BlockSpec((1, tn), lambda i, j: (0, j)),
            ],
            out_specs=pl.BlockSpec((tm, tn), lambda i, j: (i, j)),
            compiler_params=pltpu.CompilerParams(
                dimension_semantics=("parallel", "parallel"),
                vmem_limit_bytes=_VMEM_LIMIT),
        )(x, w, b2)

    return pl.pallas_call(
        functools.partial(_linear_acc_kernel, activation=activation),
        out_shape=jax.ShapeDtypeStruct((M, N), jnp.bfloat16),
        grid=(M // tm, N // tn, nk),
        in_specs=[
            pl.BlockSpec((tm, tk), lambda i, j, k: (i, k)),
            pl.BlockSpec((tk, tn), lambda i, j, k: (k, j)),
            pl.BlockSpec((1, tn), lambda i, j, k: (0, j)),
        ],
        out_specs=pl.BlockSpec((tm, tn), lambda i, j, k: (i, j)),
        scratch_shapes=[pltpu.VMEM((tm, tn), jnp.float32)],
        compiler_params=pltpu.CompilerParams(
            dimension_semantics=("parallel", "parallel", "arbitrary"),
            vmem_limit_bytes=_VMEM_LIMIT),
    )(x, w, b2)


# ---------------------------------------------------------------------------
# Packed QKV projection: one pallas_call computes x @ Wq/Wk/Wv and writes the
# result directly as a (3, M, H) tensor (output index_map scatters the column
# blocks into the three planes) -- no XLA split/transpose afterwards.
#   w: (3, H, H) bf16, b: (3, H) f32
# ---------------------------------------------------------------------------
def _qkv_kernel(x_ref, w_ref, b_ref, o_ref):
    y = jnp.dot(x_ref[...], w_ref[0],
                preferred_element_type=jnp.float32) + b_ref[0]
    o_ref[0] = y.astype(o_ref.dtype)


def linear_qkv(x, w, b, tm=512, tn=1024):
    M, K = x.shape
    n_split, K2, Hout = w.shape
    assert K2 == K
    tm = _pick_tile(M, tm, 8)
    tn = _pick_tile(Hout, tn, 128)
    nb = Hout // tn
    b3 = b.reshape(n_split, 1, Hout).astype(jnp.float32)
    return pl.pallas_call(
        _qkv_kernel,
        out_shape=jax.ShapeDtypeStruct((n_split, M, Hout), jnp.bfloat16),
        grid=(M // tm, n_split * nb),
        in_specs=[
            pl.BlockSpec((tm, K), lambda i, j: (i, 0)),
            pl.BlockSpec((1, K, tn), lambda i, j: (j // nb, 0, j % nb)),
            pl.BlockSpec((1, 1, tn), lambda i, j: (j // nb, 0, j % nb)),
        ],
        out_specs=pl.BlockSpec((1, tm, tn), lambda i, j: (j // nb, i, j % nb)),
        compiler_params=pltpu.CompilerParams(
            dimension_semantics=("parallel", "parallel"),
            vmem_limit_bytes=_VMEM_LIMIT),
    )(x, w, b3)


# ---------------------------------------------------------------------------
# Tiled linear fused with residual-add + LayerNorm epilogue
#   out = LayerNorm(x @ W + b + residual)    (N block spans full hidden dim)
# ---------------------------------------------------------------------------
def _linres_nok_kernel(x_ref, w_ref, b_ref, r_ref, g_ref, bt_ref, o_ref, *, eps):
    h = (jnp.dot(x_ref[...], w_ref[...], preferred_element_type=jnp.float32)
         + b_ref[...] + r_ref[...].astype(jnp.float32))
    o_ref[...] = _layernorm_f32(h, g_ref[...], bt_ref[...], eps).astype(o_ref.dtype)


def _linres_acc_kernel(x_ref, w_ref, b_ref, r_ref, g_ref, bt_ref, o_ref,
                       acc_ref, *, eps):
    k = pl.program_id(1)

    @pl.when(k == 0)
    def _():
        acc_ref[...] = jnp.zeros_like(acc_ref)

    acc_ref[...] += jnp.dot(x_ref[...], w_ref[...],
                            preferred_element_type=jnp.float32)

    @pl.when(k == pl.num_programs(1) - 1)
    def _():
        h = acc_ref[...] + b_ref[...] + r_ref[...].astype(jnp.float32)
        o_ref[...] = _layernorm_f32(h, g_ref[...], bt_ref[...],
                                    eps).astype(o_ref.dtype)


def linear_residual_ln(x, w, b, residual, gamma, beta, eps=1e-12,
                       tm=512, tk_target=1024):
    M, K = x.shape
    N = w.shape[1]
    tm = _pick_tile(M, tm, 8)
    tk = K if K <= tk_target else _pick_tile(K, tk_target, 128)
    nk = K // tk
    b2 = b.reshape(1, N).astype(jnp.float32)
    g2 = gamma.reshape(1, N).astype(jnp.float32)
    bt2 = beta.reshape(1, N).astype(jnp.float32)

    if nk == 1:
        return pl.pallas_call(
            functools.partial(_linres_nok_kernel, eps=eps),
            out_shape=jax.ShapeDtypeStruct((M, N), jnp.bfloat16),
            grid=(M // tm,),
            in_specs=[
                pl.BlockSpec((tm, K), lambda i: (i, 0)),
                pl.BlockSpec((K, N), lambda i: (0, 0)),
                pl.BlockSpec((1, N), lambda i: (0, 0)),
                pl.BlockSpec((tm, N), lambda i: (i, 0)),
                pl.BlockSpec((1, N), lambda i: (0, 0)),
                pl.BlockSpec((1, N), lambda i: (0, 0)),
            ],
            out_specs=pl.BlockSpec((tm, N), lambda i: (i, 0)),
            compiler_params=pltpu.CompilerParams(
                dimension_semantics=("parallel",),
                vmem_limit_bytes=_VMEM_LIMIT),
        )(x, w, b2, residual, g2, bt2)

    return pl.pallas_call(
        functools.partial(_linres_acc_kernel, eps=eps),
        out_shape=jax.ShapeDtypeStruct((M, N), jnp.bfloat16),
        grid=(M // tm, nk),
        in_specs=[
            pl.BlockSpec((tm, tk), lambda i, k: (i, k)),
            pl.BlockSpec((tk, N), lambda i, k: (k, 0)),
            pl.BlockSpec((1, N), lambda i, k: (0, 0)),
            pl.BlockSpec((tm, N), lambda i, k: (i, 0)),
            pl.BlockSpec((1, N), lambda i, k: (0, 0)),
            pl.BlockSpec((1, N), lambda i, k: (0, 0)),
        ],
        out_specs=pl.BlockSpec((tm, N), lambda i, k: (i, 0)),
        scratch_shapes=[pltpu.VMEM((tm, N), jnp.float32)],
        compiler_params=pltpu.CompilerParams(
            dimension_semantics=("parallel", "arbitrary"),
            vmem_limit_bytes=_VMEM_LIMIT),
    )(x, w, b2, residual, g2, bt2)


# ---------------------------------------------------------------------------
# Standalone row-tiled LayerNorm (embedding output)
# ---------------------------------------------------------------------------
def _ln_kernel(x_ref, g_ref, b_ref, o_ref, *, eps):
    h = x_ref[...].astype(jnp.float32)
    o_ref[...] = _layernorm_f32(h, g_ref[...], b_ref[...], eps).astype(o_ref.dtype)


def layernorm(x, gamma, beta, eps=1e-12, tm=512):
    M, H = x.shape
    tm = _pick_tile(M, tm, 8)
    return pl.pallas_call(
        functools.partial(_ln_kernel, eps=eps),
        out_shape=jax.ShapeDtypeStruct((M, H), jnp.bfloat16),
        grid=(M // tm,),
        in_specs=[
            pl.BlockSpec((tm, H), lambda i: (i, 0)),
            pl.BlockSpec((1, H), lambda i: (0, 0)),
            pl.BlockSpec((1, H), lambda i: (0, 0)),
        ],
        out_specs=pl.BlockSpec((tm, H), lambda i: (i, 0)),
        compiler_params=pltpu.CompilerParams(
            dimension_semantics=("parallel",)),
    )(x, gamma.reshape(1, H).astype(jnp.float32),
      beta.reshape(1, H).astype(jnp.float32))


# ---------------------------------------------------------------------------
# Flash-style multi-head attention, all heads per grid step.
#   qkv: (3, B, S, H) bf16 (plane 0=Q, 1=K, 2=V), mask_bias: (B, 1, S) f32
#   output: (B, S, H) bf16 (lane-dense store, no head merge transpose needed)
# ---------------------------------------------------------------------------
def _flash_attn_kernel(q_ref, k_ref, v_ref, bias_ref, o_ref,
                       m_sc, l_sc, acc_sc, *, scale, num_heads, head_dim):
    ki = pl.program_id(2)

    @pl.when(ki == 0)
    def _():
        m_sc[...] = jnp.full_like(m_sc, -jnp.inf)
        l_sc[...] = jnp.zeros_like(l_sc)
        acc_sc[...] = jnp.zeros_like(acc_sc)

    q_all = q_ref[0, 0]                          # (tq, H) bf16
    k_all = k_ref[0, 0]                          # (tkv, H) bf16
    v_all = v_ref[0, 0]                          # (tkv, H) bf16
    bias = bias_ref[0]                           # (1, tkv) f32 additive mask

    for h in range(num_heads):                   # static unroll over heads
        lo = h * head_dim
        q = q_all[:, lo:lo + head_dim]
        k = k_all[:, lo:lo + head_dim]
        v = v_all[:, lo:lo + head_dim]
        s = jax.lax.dot_general(q, k, (((1,), (1,)), ((), ())),
                                preferred_element_type=jnp.float32)
        s = s * scale + bias                     # (tq, tkv)

        m_prev = m_sc[h]
        m_new = jnp.maximum(m_prev, jnp.max(s, axis=-1, keepdims=True))
        alpha = jnp.exp(m_prev - m_new)
        p = jnp.exp(s - m_new)
        l_sc[h] = alpha * l_sc[h] + jnp.sum(p, axis=-1, keepdims=True)
        acc_sc[h] = alpha * acc_sc[h] + jnp.dot(
            p.astype(v.dtype), v, preferred_element_type=jnp.float32)
        m_sc[h] = m_new

    @pl.when(ki == pl.num_programs(2) - 1)
    def _():
        parts = []
        for h in range(num_heads):
            inv_l = pl.reciprocal(l_sc[h], approx=True)
            parts.append(acc_sc[h] * inv_l)
        o_ref[0] = jnp.concatenate(parts, axis=-1).astype(o_ref.dtype)


def flash_attention(qkv, mask_bias, num_heads, scale, tq=256, tkv=256):
    _, B, S, H = qkv.shape
    d = H // num_heads
    tq = _pick_tile(S, tq, 128)
    tkv = _pick_tile(S, tkv, 128)
    kern = functools.partial(_flash_attn_kernel, scale=scale,
                             num_heads=num_heads, head_dim=d)
    return pl.pallas_call(
        kern,
        out_shape=jax.ShapeDtypeStruct((B, S, H), jnp.bfloat16),
        grid=(B, S // tq, S // tkv),
        in_specs=[
            pl.BlockSpec((1, 1, tq, H), lambda b, qi, ki: (0, b, qi, 0)),
            pl.BlockSpec((1, 1, tkv, H), lambda b, qi, ki: (1, b, ki, 0)),
            pl.BlockSpec((1, 1, tkv, H), lambda b, qi, ki: (2, b, ki, 0)),
            pl.BlockSpec((1, 1, tkv), lambda b, qi, ki: (b, 0, ki)),
        ],
        out_specs=pl.BlockSpec((1, tq, H), lambda b, qi, ki: (b, qi, 0)),
        scratch_shapes=[
            pltpu.VMEM((num_heads, tq, 1), jnp.float32),
            pltpu.VMEM((num_heads, tq, 1), jnp.float32),
            pltpu.VMEM((num_heads, tq, d), jnp.float32),
        ],
        compiler_params=pltpu.CompilerParams(
            dimension_semantics=("parallel", "parallel", "arbitrary"),
            vmem_limit_bytes=_VMEM_LIMIT),
    )(qkv, qkv, qkv, mask_bias)


# ---------------------------------------------------------------------------
# Fused pooler (tanh dense on CLS) + classifier (bf16 operands, f32 acc)
# ---------------------------------------------------------------------------
def _pool_clf_kernel(x_ref, pw_ref, pb_ref, cw_ref, cb_ref, o_ref):
    pooled = jnp.tanh(
        jnp.dot(x_ref[...], pw_ref[...],
                preferred_element_type=jnp.float32) + pb_ref[...])
    logits = jnp.dot(pooled.astype(cw_ref.dtype), cw_ref[...],
                     preferred_element_type=jnp.float32) + cb_ref[...]
    o_ref[...] = logits


def pooler_classifier(x_cls, pool_w, pool_b, clf_w, clf_b):
    B, H = x_cls.shape
    L = clf_w.shape[1]
    return pl.pallas_call(
        _pool_clf_kernel,
        out_shape=jax.ShapeDtypeStruct((B, L), jnp.float32),
        grid=(1,),
        in_specs=[
            pl.BlockSpec((B, H), lambda i: (0, 0)),
            pl.BlockSpec((H, H), lambda i: (0, 0)),
            pl.BlockSpec((1, H), lambda i: (0, 0)),
            pl.BlockSpec((H, L), lambda i: (0, 0)),
            pl.BlockSpec((1, L), lambda i: (0, 0)),
        ],
        out_specs=pl.BlockSpec((B, L), lambda i: (0, 0)),
    )(x_cls, pool_w, pool_b.reshape(1, H).astype(jnp.float32),
      clf_w, clf_b.reshape(1, L).astype(jnp.float32))


# ---------------------------------------------------------------------------
# Parameter construction (deterministic, synthetic "pretrained" weights).
# ---------------------------------------------------------------------------
def init_params(key, cfg):
    H, I = cfg["hidden"], cfg["inter"]
    bf = jnp.bfloat16

    def nrm(k, shape):
        return 0.02 * jax.random.normal(k, shape, jnp.float32)

    keys = iter(jax.random.split(key, 16 + 8 * cfg["layers"]))
    p = {
        "word_emb": nrm(next(keys), (cfg["vocab"], H)),
        "pos_emb": nrm(next(keys), (cfg["max_pos"], H)),
        "type_emb": nrm(next(keys), (cfg["types"], H)),
        "emb_ln_g": jnp.ones((H,), jnp.float32),
        "emb_ln_b": jnp.zeros((H,), jnp.float32),
        "layers": [],
    }
    for _ in range(cfg["layers"]):
        lp = {
            # packed Q/K/V projection stored as (3, H, H): one fused matmul
            "wqkv": nrm(next(keys), (3, H, H)).astype(bf),
            "bqkv": jnp.zeros((3, H), jnp.float32),
            "wo": nrm(next(keys), (H, H)).astype(bf),
            "bo": jnp.zeros((H,), jnp.float32),
            "ln1_g": jnp.ones((H,), jnp.float32),
            "ln1_b": jnp.zeros((H,), jnp.float32),
            "wi": nrm(next(keys), (H, I)).astype(bf),
            "bi": jnp.zeros((I,), jnp.float32),
            "wo2": nrm(next(keys), (I, H)).astype(bf),
            "bo2": jnp.zeros((H,), jnp.float32),
            "ln2_g": jnp.ones((H,), jnp.float32),
            "ln2_b": jnp.zeros((H,), jnp.float32),
        }
        p["layers"].append(lp)
    p["pool_w"] = nrm(next(keys), (H, H)).astype(bf)
    p["pool_b"] = jnp.zeros((H,), jnp.float32)
    p["clf_w"] = nrm(next(keys), (H, cfg["labels"])).astype(bf)
    p["clf_b"] = jnp.zeros((cfg["labels"],), jnp.float32)
    return p


# ---------------------------------------------------------------------------
# Full forward pass (BertModel + pooler + dropout(identity) + classifier)
# ---------------------------------------------------------------------------
def bert_for_seq_clf(params, input_ids, attention_mask, token_type_ids, cfg):
    B, S = input_ids.shape
    H, nH = cfg["hidden"], cfg["heads"]
    d = H // nH
    M = B * S
    scale = 1.0 / math.sqrt(d)

    # --- embeddings (gathers are glue; LayerNorm runs in a Pallas kernel) ---
    pos_ids = jnp.arange(S)
    emb = (jnp.take(params["word_emb"], input_ids, axis=0)
           + params["pos_emb"][pos_ids][None, :, :]
           + jnp.take(params["type_emb"], token_type_ids, axis=0))
    x = layernorm(emb.reshape(M, H), params["emb_ln_g"], params["emb_ln_b"])
    # TODO(synk): embedding / hidden / attention dropout omitted — inference mode.

    # additive mask bias precomputed once, shared by all layers
    mask_bias = ((1.0 - attention_mask.astype(jnp.float32))
                 * (-10000.0)).reshape(B, 1, S)

    # --- encoder layers ---
    for lp in params["layers"]:
        qkv3 = linear_qkv(x, lp["wqkv"], lp["bqkv"])        # (3, M, H) bf16
        qkv3 = qkv3.reshape(3, B, S, H)                     # free reshape
        ctx = flash_attention(qkv3, mask_bias, nH, scale)   # (B, S, H) bf16

        # attention output projection fused with residual-add + LayerNorm
        x = linear_residual_ln(ctx.reshape(M, H), lp["wo"], lp["bo"], x,
                               lp["ln1_g"], lp["ln1_b"])
        # FFN up-projection with GELU epilogue
        inter = linear(x, lp["wi"], lp["bi"], activation="gelu")
        # FFN down-projection fused with residual-add + LayerNorm
        x = linear_residual_ln(inter, lp["wo2"], lp["bo2"], x,
                               lp["ln2_g"], lp["ln2_b"])

    # --- pooler (tanh dense on [CLS]) + classifier, fused in one kernel ---
    cls_rows = x.reshape(B, S, H)[:, 0, :]
    logits = pooler_classifier(cls_rows, params["pool_w"], params["pool_b"],
                               params["clf_w"], params["clf_b"])
    return logits


# ---------------------------------------------------------------------------
if __name__ == "__main__":
    cfg = dict(vocab=128, hidden=64, layers=2, heads=4, inter=128,
               max_pos=64, types=2, labels=4)
    B, S = 2, 8

    root = jax.random.PRNGKey(0)
    k_params, k_ids = jax.random.split(root)

    params = init_params(k_params, cfg)

    input_ids = jax.random.randint(k_ids, (B, S), 0, cfg["vocab"],
                                   dtype=jnp.int32)
    attention_mask = jnp.array(
        [[1, 1, 1, 1, 1, 1, 1, 1],
         [1, 1, 1, 1, 1, 1, 0, 0]], dtype=jnp.int32)
    token_type_ids = jnp.array(
        [[0, 0, 0, 0, 1, 1, 1, 1],
         [0, 0, 0, 1, 1, 1, 1, 1]], dtype=jnp.int32)

    logits = bert_for_seq_clf(params, input_ids, attention_mask,
                              token_type_ids, cfg)
    jax.block_until_ready(logits)
    assert logits.shape == (B, cfg["labels"])
    print("KERNEL_OK")
</pallas_src>

<mosaic_0001>
module attributes {stable_mosaic.version = 11 : i64} {
  func.func @_ln_kernel(%arg0: i32, %arg1: memref<16x64xf32, #tpu.memory_space<vmem>>, %arg2: memref<1x64xf32, #tpu.memory_space<vmem>>, %arg3: memref<1x64xf32, #tpu.memory_space<vmem>>, %arg4: memref<16x64xbf16, #tpu.memory_space<vmem>>) attributes {dimension_semantics = [#tpu.dimension_semantics<parallel>], iteration_bounds = array<i64: 1>, scalar_prefetch = 0 : i64, scratch_operands = 0 : i64, tpu.core_type = #tpu.core_type<tc>, window_params = [{transform_indices = @transform_0, window_bounds = array<i64: 16, 64>}, {pipeline_mode = #tpu.pipeline_mode<synchronous>, transform_indices = @transform_1, window_bounds = array<i64: 1, 64>}, {pipeline_mode = #tpu.pipeline_mode<synchronous>, transform_indices = @transform_2, window_bounds = array<i64: 1, 64>}, {transform_indices = @transform_3, window_bounds = array<i64: 16, 64>}]} {
    %c0 = arith.constant 0 : index
    %c0_0 = arith.constant 0 : index
    %0 = vector.load %arg1[%c0, %c0_0] : memref<16x64xf32, #tpu.memory_space<vmem>>, vector<16x64xf32>
    %c0_1 = arith.constant 0 : index
    %c0_2 = arith.constant 0 : index
    %1 = vector.load %arg2[%c0_1, %c0_2] : memref<1x64xf32, #tpu.memory_space<vmem>>, vector<1x64xf32>
    %c0_3 = arith.constant 0 : index
    %c0_4 = arith.constant 0 : index
    %2 = vector.load %arg3[%c0_3, %c0_4] : memref<1x64xf32, #tpu.memory_space<vmem>>, vector<1x64xf32>
    %cst = arith.constant dense<0.000000e+00> : vector<16xf32>
    %3 = vector.multi_reduction <add>, %0, %cst [1] : vector<16x64xf32> to vector<16xf32>
    %4 = vector.shape_cast %3 : vector<16xf32> to vector<16x1xf32>
    %cst_5 = arith.constant 6.400000e+01 : f32
    %5 = vector.broadcast %cst_5 : f32 to vector<16x1xf32>
    %6 = arith.divf %4, %5 : vector<16x1xf32>
    %7 = vector.broadcast %6 : vector<16x1xf32> to vector<16x64xf32>
    %8 = arith.subf %0, %7 : vector<16x64xf32>
    %9 = arith.mulf %8, %8 : vector<16x64xf32>
    %cst_6 = arith.constant dense<0.000000e+00> : vector<16xf32>
    %10 = vector.multi_reduction <add>, %9, %cst_6 [1] : vector<16x64xf32> to vector<16xf32>
    %11 = vector.shape_cast %10 : vector<16xf32> to vector<16x1xf32>
    %cst_7 = arith.constant 6.400000e+01 : f32
    %12 = vector.broadcast %cst_7 : f32 to vector<16x1xf32>
    %13 = arith.divf %11, %12 : vector<16x1xf32>
    %14 = vector.broadcast %6 : vector<16x1xf32> to vector<16x64xf32>
    %15 = arith.subf %0, %14 : vector<16x64xf32>
    %cst_8 = arith.constant 9.99999996E-13 : f32
    %16 = vector.broadcast %cst_8 : f32 to vector<16x1xf32>
    %17 = arith.addf %13, %16 : vector<16x1xf32>
    %18 = math.rsqrt %17 : vector<16x1xf32>
    %19 = vector.broadcast %18 : vector<16x1xf32> to vector<16x64xf32>
    %20 = arith.mulf %15, %19 : vector<16x64xf32>
    %21 = vector.broadcast %1 : vector<1x64xf32> to vector<16x64xf32>
    %22 = arith.mulf %20, %21 : vector<16x64xf32>
    %23 = vector.broadcast %2 : vector<1x64xf32> to vector<16x64xf32>
    %24 = arith.addf %22, %23 : vector<16x64xf32>
    %25 = arith.truncf %24 : vector<16x64xf32> to vector<16x64xbf16>
    %c0_9 = arith.constant 0 : index
    %c0_10 = arith.constant 0 : index
    %26 = vector.load %arg4[%c0_9, %c0_10] : memref<16x64xbf16, #tpu.memory_space<vmem>>, vector<16x64xbf16>
    tpu.vector_store %arg4[%c0_9, %c0_10], %25 {strides = array<i32>} : memref<16x64xbf16, #tpu.memory_space<vmem>>, vector<16x64xbf16>,
    return
  }
  func.func @transform_0(%arg0: i32) -> (i32, i32) {
    %c0_i32 = arith.constant 0 : i32
    %c0_i32_0 = arith.constant 0 : i32
    return %arg0, %c0_i32 : i32, i32
  }
  func.func @transform_1(%arg0: i32) -> (i32, i32) {
    %c0_i32 = arith.constant 0 : i32
    %c0_i32_0 = arith.constant 0 : i32
    %c0_i32_1 = arith.constant 0 : i32
    return %c0_i32, %c0_i32_0 : i32, i32
  }
  func.func @transform_2(%arg0: i32) -> (i32, i32) {
    %c0_i32 = arith.constant 0 : i32
    %c0_i32_0 = arith.constant 0 : i32
    %c0_i32_1 = arith.constant 0 : i32
    return %c0_i32, %c0_i32_0 : i32, i32
  }
  func.func @transform_3(%arg0: i32) -> (i32, i32) {
    %c0_i32 = arith.constant 0 : i32
    %c0_i32_0 = arith.constant 0 : i32
    return %arg0, %c0_i32 : i32, i32
  }
}

</mosaic_0001>

<bundles_post_ra>
// kernel: tpu_custom_call.1
= control target key start
LH: loop header
LB: loop body
LE: loop exit
PB: predicated region body
PF: predicated region fallthrough
CT: control target
= control target key end

     0   :  { %8 = vsyncpa [#allocation3], 0  ;;  %s229_s0 = inlined_call_operand.hbm [shape: f32[16,64], index: 0, kind: input, shape index: {}]   ;;  %s230_s1 = inlined_call_operand.vmem [shape: f32[1,64], index: 1, kind: input, shape index: {}]   ;;  %s231_s2 = inlined_call_operand.vmem [shape: f32[1,64], index: 2, kind: input, shape index: {}]   ;;  %s232_s3 = inlined_call_operand.hbm [shape: bf16[16,64], index: 3, kind: output, shape index: {}]  }
   0x1   :  { %9 = vsyncpa [#allocation4], 0  ;;  %s169_s12 = smov [#allocation2]   ;;  %s121_s16 = scalar_lea.hbm %s229_s0, 256 }
   0x2   :  { %s15_s13 = sshll.u32 %s169_s12, 4  ;;  %p122_p0 = scmp.ne.s32.totalorder %s229_s0, %s121_s16  ;;  %s16_s13 = int_to_ptr.vmem [resolvable:$true] %s15_s13 }
   0x3   :  { %p125_p1 = scmp.lt.u32.totalorder %s121_s16, %s229_s0 }
   0x5   :  { %p127_p2 = pnand %p125_p1, %p122_p0 }
   0x7   :  { %130 = shalt.err (!%p127_p2)
}
   0x8   :  { %s131_s21 = scalar_lea.vmem %s16_s13, 256  ;;  %p136_p4 = scmp.lt.s32.totalorder %s16_s13, %s16_s13 }
   0x9   :  { %p132_p3 = scmp.ne.s32.totalorder %s16_s13, %s131_s21  ;;  %p137_p5 = scmp.lt.s32.totalorder %s131_s21, %s131_s21 }
   0xb   :  { %p138_p6 = por %p137_p5, %p136_p4 }
   0xd   :  { %p139_p7 = pnand %p138_p6, %p132_p3 }
   0xf   :  { %142 = shalt.err (!%p139_p7)
}
  0x10   :  { %s170_s22 = smov 128   ;;  %s171_s23 = smov 8  }
  0x11   :  { %21 = dma.hbm_to_vmem [thread:$0]  %s229_s0, 256, %s16_s13, [#allocation3], %s170_s22, %s170_s22, %s171_s23  }
  0x12   :  { %165 = dma.done.wait [#allocation3], 256  }
  0x13   :  { %166 = vsyncadd [#allocation3], 4294967040  ;;  %vm33_vm0 = vcmask 523264   ;;  %v29_v0 = vld [vmem:[#allocation2] sm:$0xff]  ;;  %v30_v1 = vld [vmem:[#allocation2 + $0x8] sm:$0xff]  ;;  %vm85_vm1 = vcmask 519168  }
  0x14   :  { %v34_v2 = vsel %vm33_vm0, %v29_v0, 0.0  ;;  %v37_v3 = vsel %vm33_vm0, %v30_v1, 0.0  ;;  %v105_v21 = vld [vmem:[%s230_s1] ss:$0 sm:$0xff]  ;;  %s172_s29 = smov [#allocation5]  }
  0x15   :  { %35 = vadd.xlane.f32.xlu0 %v34_v2  ;;  %v106_v23 = vld [vmem:[%s231_s2] ss:$0 sm:$0xff]  ;;  %s93_s30 = sshll.u32 %s172_s29, 4  ;;  %s94_s30 = int_to_ptr.vmem [resolvable:$true] %s93_s30 }
  0x16   :  { %s143_s1 = scalar_lea.vmem %s94_s30, 128  ;;  %p148_p9 = scmp.lt.s32.totalorder %s94_s30, %s94_s30 }
  0x17   :  { %p144_p8 = scmp.ne.s32.totalorder %s94_s30, %s143_s1  ;;  %p149_p10 = scmp.lt.s32.totalorder %s143_s1, %s143_s1 }
  0x19   :  { %38 = vadd.xlane.f32.xlu0 %v37_v3  ;;  %p150_p11 = por %p149_p10, %p148_p9 }
  0x1b   :  { %p151_p12 = pnand %p150_p11, %p144_p8 }
  0xa2   :  { %v36_v4 = vpop.xlane.xlu0 %35 }
  0xa3   :  { %v41_v5 = vmul.f32 0.015625, %v36_v4 }
  0xa5   :  { %v43_v6 = vsub.f32 %v29_v0, %v41_v5 }
  0xa6   :  { %v39_v7 = vpop.xlane.xlu0 %38 }
  0xa7   :  { %v42_v8 = vmul.f32 0.015625, %v39_v7  ;;  %v45_v9 = vmul.f32 %v43_v6, %v43_v6 }
  0xa9   :  { %v44_v10 = vsub.f32 %v30_v1, %v42_v8  ;;  %v47_v11 = vsel %vm33_vm0, %v45_v9, 0.0 }
  0xaa   :  { %48 = vadd.xlane.f32.xlu1 %v47_v11 }
  0xab   :  { %v46_v12 = vmul.f32 %v44_v10, %v44_v10 }
  0xad   :  { %v50_v13 = vsel %vm33_vm0, %v46_v12, 0.0 }
  0xae   :  { %51 = vadd.xlane.f32.xlu1 %v50_v13 }
 0x137   :  { %v49_v14 = vpop.xlane.xlu1 %48 }
 0x138   :  { %v53_v15 = vmul.f32 0.015625, %v49_v14 }
 0x13a   :  { %v55_v16 = vadd.f32 1e-12, %v53_v15 }
 0x13b   :  { %v52_v17 = vpop.xlane.xlu1 %51 }
 0x13c   :  { %117 = vrsqrt.f32 %v55_v16  ;;  %v54_v18 = vmul.f32 0.015625, %v52_v17 }
 0x13e   :  { %v56_v19 = vadd.f32 1e-12, %v54_v18 }
 0x140   :  { %119 = vrsqrt.f32 %v56_v19 }
 0x146   :  { %v118_v20 = vpop.eup %117 }
 0x147   :  { %v59_v22 = vmul.f32 %v118_v20, %v43_v6 }
 0x149   :  { %v67_v24 = vmul.f32 %v105_v21, %v59_v22 }
 0x14a   :  { %v120_v25 = vpop.eup %119 }
 0x14b   :  { %v60_v26 = vmul.f32 %v120_v25, %v44_v10  ;;  %v75_v27 = vadd.f32 %v106_v23, %v67_v24 }
 0x14d   :  { %v68_v28 = vmul.f32 %v105_v21, %v60_v26  ;;  %v109_v29 = vpack.c.bf16 %v75_v27, %v75_v27 }
 0x14f   :  { %v76_v30 = vadd.f32 %v106_v23, %v68_v28  ;;  %86 = vst.msk [vmem:[#allocation5] sm:$0xf] %vm85_vm1, %v109_v29 }
 0x151   :  { %v110_v31 = vpack.c.bf16 %v76_v30, %v76_v30 }
 0x153   :  { %87 = vst.msk [vmem:[#allocation5 + $0x4] sm:$0xf] %vm85_vm1, %v110_v31 }
 0x154   :  { %154 = shalt.err (!%p151_p12)
}
 0x155   :  { %s155_s5 = scalar_lea.hbm %s232_s3, 128 }
 0x156   :  { %p156_p13 = scmp.ne.s32.totalorder %s232_s3, %s155_s5  ;;  %p159_p0 = scmp.lt.u32.totalorder %s155_s5, %s232_s3 }
 0x158   :  { %p161_p1 = pnand %p159_p0, %p156_p13 }
 0x15a   :  { %164 = shalt.err (!%p161_p1)
}
 0x15b   :  { %s173_s10 = smov 64   ;;  %s174_s11 = smov 4  }
 0x15c   :  { %99 = dma.vmem_to_hbm [thread:$0]  %s94_s30, 128, %s232_s3, [#allocation4], %s173_s10, %s173_s10, %s174_s11  }
 0x15d   :  { %167 = dma.done.wait [#allocation4], 128  }
 0x15e   :  { %168 = vsyncadd [#allocation4], 4294967168 }
 0x15f   :  { %103 = vsyncpa [#allocation3], 1 }
 0x160   :  { %104 = vsyncpa [#allocation4], 1 }

</bundles_post_ra>
